<compile_context>
chip_gen: v7x
topology: tpu7x:2x2x1
jax: 0.10.0
libtpu: 0.0.40
codegen_flags: <defaults>
</compile_context>

<pallas_src>
import jax
import jax.numpy as jnp
from jax.experimental import pallas as pl
from jax.experimental.pallas import tpu as pltpu


def _round_up(x, m):
    return ((x + m - 1) // m) * m


def _linear_bias_kernel(x_ref, w_ref, b_ref, o_ref):
    # x_ref: (TB, K)  w_ref: (K, N)  b_ref: (1, N)  o_ref: (TB, N)
    # One MXU matmul with f32 accumulate; bias broadcast-add on the VPU.
    acc = jnp.dot(x_ref[...], w_ref[...], preferred_element_type=jnp.float32)
    o_ref[...] = (acc + b_ref[...].astype(jnp.float32)).astype(o_ref.dtype)


def transformation_predictor_forward(feat, weight_t, bias, *, max_block_b=4096):
    """feat: (B, nz_feat); weight_t: (nz_feat, kp_size*3); bias: (kp_size*3,).

    Returns translations_pred of shape (B, 1, kp_size, 3), matching the
    PyTorch module's output.
    """
    B, nz_feat = feat.shape
    out_dim = weight_t.shape[1]
    assert out_dim % 3 == 0
    kp_size = out_dim // 3

    bias2d = bias.reshape(1, out_dim)

    # --- Batch tiling -----------------------------------------------------
    if B <= 8:
        # Single full-dim block: no padding, grid of 1.
        tb, b_pad = B, B
    else:
        # Target ~2 grid steps so the "parallel" axis can shard across the two
        # TensorCores on v7x; extra step cost is negligible on v5e/v6e. Cap the
        # tile so per-step VMEM (double-buffered x + out + resident w/b) stays
        # around 2 MiB — safe under 16/32 MiB scoped limits on all generations.
        tb = min(max_block_b, _round_up(pl.cdiv(_round_up(B, 8), 2), 8))
        b_pad = _round_up(B, tb)

    x = feat if b_pad == B else jnp.pad(feat, ((0, b_pad - B), (0, 0)))

    grid = (b_pad // tb,)
    out = pl.pallas_call(
        _linear_bias_kernel,
        out_shape=jax.ShapeDtypeStruct((b_pad, out_dim), feat.dtype),
        grid_spec=pl.GridSpec(
            grid=grid,
            in_specs=[
                pl.BlockSpec((tb, nz_feat), lambda i: (i, 0)),
                pl.BlockSpec((nz_feat, out_dim), lambda i: (0, 0)),
                pl.BlockSpec((1, out_dim), lambda i: (0, 0)),
            ],
            out_specs=pl.BlockSpec((tb, out_dim), lambda i: (i, 0)),
        ),
        compiler_params=pltpu.CompilerParams(
            dimension_semantics=("parallel",),
        ),
    )(x, weight_t, bias2d)

    if b_pad != B:
        out = out[:B]

    # feat[:, None] in the reference adds the singleton "time" axis, then the
    # result is viewed as (B, 1, kp_size, 3).
    return out.reshape(B, 1, kp_size, 3)


if __name__ == "__main__":
    # Small shapes consistent with the module.
    B = 2
    nz_feat = 32
    kp_size = 8
    out_dim = kp_size * 3

    key = jax.random.PRNGKey(0)
    k_feat, k_w, k_b, k_feat2 = jax.random.split(key, 4)

    feat = jax.random.normal(k_feat, (B, nz_feat), dtype=jnp.float32)

    # Deterministic parameter init mirroring the module's __init__:
    #   weight ~ Normal(0, 1e-5)   (stored here transposed: (nz_feat, out_dim))
    #   bias   ~ Uniform(-1/sqrt(nz_feat), 1/sqrt(nz_feat))  (nn.Linear default)
    weight_t = 1e-5 * jax.random.normal(k_w, (nz_feat, out_dim), dtype=jnp.float32)
    bound = 1.0 / jnp.sqrt(jnp.float32(nz_feat))
    bias = jax.random.uniform(
        k_b, (out_dim,), dtype=jnp.float32, minval=-bound, maxval=bound
    )

    translations_pred = transformation_predictor_forward(feat, weight_t, bias)
    translations_pred = jax.block_until_ready(translations_pred)

    # Sanity check against a pure-JAX reference.
    ref = (feat @ weight_t + bias).reshape(B, 1, kp_size, 3)
    assert translations_pred.shape == (B, 1, kp_size, 3)
    assert jnp.allclose(translations_pred, ref, atol=1e-5, rtol=1e-5)

    # Exercise the tiled / batch-padded path as well (B not a multiple of 8).
    B2 = 50
    feat2 = jax.random.normal(k_feat2, (B2, nz_feat), dtype=jnp.float32)
    out2 = jax.block_until_ready(
        transformation_predictor_forward(feat2, weight_t, bias)
    )
    ref2 = (feat2 @ weight_t + bias).reshape(B2, 1, kp_size, 3)
    assert out2.shape == (B2, 1, kp_size, 3)
    assert jnp.allclose(out2, ref2, atol=1e-5, rtol=1e-5)

    print("KERNEL_OK")
</pallas_src>

<mosaic_0001>
module attributes {stable_mosaic.version = 11 : i64} {
  func.func @_linear_bias_kernel(%arg0: i32, %arg1: memref<2x32xf32, #tpu.memory_space<vmem>>, %arg2: memref<32x24xf32, #tpu.memory_space<vmem>>, %arg3: memref<1x24xf32, #tpu.memory_space<vmem>>, %arg4: memref<2x24xf32, #tpu.memory_space<vmem>>) attributes {dimension_semantics = [#tpu.dimension_semantics<parallel>], iteration_bounds = array<i64: 1>, scalar_prefetch = 0 : i64, scratch_operands = 0 : i64, tpu.core_type = #tpu.core_type<tc>, window_params = [{transform_indices = @transform_0, window_bounds = array<i64: 2, 32>}, {pipeline_mode = #tpu.pipeline_mode<synchronous>, transform_indices = @transform_1, window_bounds = array<i64: 32, 24>}, {pipeline_mode = #tpu.pipeline_mode<synchronous>, transform_indices = @transform_2, window_bounds = array<i64: 1, 24>}, {transform_indices = @transform_3, window_bounds = array<i64: 2, 24>}]} {
    %c0 = arith.constant 0 : index
    %c0_0 = arith.constant 0 : index
    %0 = vector.load %arg1[%c0, %c0_0] : memref<2x32xf32, #tpu.memory_space<vmem>>, vector<2x32xf32>
    %c0_1 = arith.constant 0 : index
    %c0_2 = arith.constant 0 : index
    %1 = vector.load %arg2[%c0_1, %c0_2] : memref<32x24xf32, #tpu.memory_space<vmem>>, vector<32x24xf32>
    %cst = arith.constant dense<0.000000e+00> : vector<2x24xf32>
    %2 = tpu.matmul %0, %1, %cst {dimension_numbers = #tpu.dot_dimension_numbers<[1], [0], [0], [1], [0, 0, 1, 1], [], []>} : vector<2x32xf32>, vector<32x24xf32>, vector<2x24xf32> -> vector<2x24xf32>
    %c0_3 = arith.constant 0 : index
    %c0_4 = arith.constant 0 : index
    %3 = vector.load %arg3[%c0_3, %c0_4] : memref<1x24xf32, #tpu.memory_space<vmem>>, vector<1x24xf32>
    %4 = vector.broadcast %3 : vector<1x24xf32> to vector<2x24xf32>
    %5 = arith.addf %2, %4 : vector<2x24xf32>
    %c0_5 = arith.constant 0 : index
    %c0_6 = arith.constant 0 : index
    %6 = vector.load %arg4[%c0_5, %c0_6] : memref<2x24xf32, #tpu.memory_space<vmem>>, vector<2x24xf32>
    tpu.vector_store %arg4[%c0_5, %c0_6], %5 {strides = array<i32>} : memref<2x24xf32, #tpu.memory_space<vmem>>, vector<2x24xf32>,
    return
  }
  func.func @transform_0(%arg0: i32) -> (i32, i32) {
    %c0_i32 = arith.constant 0 : i32
    %c0_i32_0 = arith.constant 0 : i32
    return %arg0, %c0_i32 : i32, i32
  }
  func.func @transform_1(%arg0: i32) -> (i32, i32) {
    %c0_i32 = arith.constant 0 : i32
    %c0_i32_0 = arith.constant 0 : i32
    %c0_i32_1 = arith.constant 0 : i32
    return %c0_i32, %c0_i32_0 : i32, i32
  }
  func.func @transform_2(%arg0: i32) -> (i32, i32) {
    %c0_i32 = arith.constant 0 : i32
    %c0_i32_0 = arith.constant 0 : i32
    %c0_i32_1 = arith.constant 0 : i32
    return %c0_i32, %c0_i32_0 : i32, i32
  }
  func.func @transform_3(%arg0: i32) -> (i32, i32) {
    %c0_i32 = arith.constant 0 : i32
    %c0_i32_0 = arith.constant 0 : i32
    return %arg0, %c0_i32 : i32, i32
  }
}

</mosaic_0001>

<bundles_post_ra>
// kernel: tpu_custom_call.1
= control target key start
LH: loop header
LB: loop body
LE: loop exit
PB: predicated region body
PF: predicated region fallthrough
CT: control target
= control target key end

     0   :  { %v169_v3 = vmov 0.0|0.0   ;;  %vm170_vm0 = vmmov 0   ;;  %v171_v6 = vmov 0.0   ;;  %s223_s0 = inlined_call_operand.vmem [shape: f32[2,32], index: 0, kind: input, shape index: {}]   ;;  %s224_s1 = inlined_call_operand.vmem [shape: f32[32,24], index: 1, kind: input, shape index: {}]   ;;  %s225_s2 = inlined_call_operand.vmem [shape: f32[1,24], index: 2, kind: input, shape index: {}]   ;;  %s226_s3 = inlined_call_operand.hbm [shape: f32[2,24], index: 3, kind: output, shape index: {}]  }
   0x1   :  { %v16_v0 = vld [vmem:[%s224_s1] sm:$0xff]  ;;  %v17_v1 = vld [vmem:[%s224_s1 + $0x8] sm:$0xff]  ;;  %v18_v2 = vld [vmem:[%s224_s1 + $0x10] sm:$0xff]  ;;  %135 = vmatprep.subr.bf16.mxu0 %v169_v3  ;;  %132 = vmatprep.mubr.msk.f32.mxu0 %vm170_vm0, %v171_v6 }
   0x2   :  { %v136_v4 = vpack.c.bf16 %v17_v1, %v16_v0  ;;  %v19_v5 = vld [vmem:[%s224_s1 + $0x18] sm:$0xff] }
   0x3   :  { %8 = vsyncpa [#allocation3], 0  ;;  %v139_v7 = vpack.c.bf16 %v19_v5, %v18_v2  ;;  %v15_v8 = vld [vmem:[%s223_s0] sm:$0x3]  ;;  %vm27_vm1 = vcmask 261120   ;;  %s172_s24 = smov [#allocation2]  }
   0x4   :  { %137 = vmatpush3.bf16.msra.mxu0 %v136_v4  ;;  %v117_v9 = vld [vmem:[%s225_s2] ss:$0 sm:$0xff]  ;;  %s109_s1 = sshll.u32 %s172_s24, 4  ;;  %vm101_vm2 = vcmask 189440   ;;  %s110_s1 = int_to_ptr.vmem [resolvable:$true] %s109_s1 }
   0x5   :  { %138 = vmatprep.subr.bf16.mxu0 %v169_v3  ;;  %s145_s25 = scalar_lea.vmem %s110_s1, 32  ;;  %p150_p1 = scmp.lt.s32.totalorder %s110_s1, %s110_s1 }
   0x6   :  { %p146_p0 = scmp.ne.s32.totalorder %s110_s1, %s145_s25  ;;  %p151_p2 = scmp.lt.s32.totalorder %s145_s25, %s145_s25 }
   0x8   :  { %140 = vmatpush3.bf16.msra.mxu0 %v139_v7  ;;  %p152_p3 = por %p151_p2, %p150_p1 }
   0xa   :  { %p153_p4 = pnand %p152_p3, %p146_p0 }
   0xb   :  { %133 = vmatmul.mubr.msk.f32.vlgmr.msra.gmra.mrb[0].mxu0 %vm27_vm1, %v15_v8 }
  0xde   :  { %v97_v10 = vpop.f32.mrb[0].mxu0 }
  0xdf   :  { %v98_v11 = vadd.f32 %v117_v9, %v97_v10  ;;  %v134_v12 = vpop.f32.mrb[1].mxu0 }
  0xe1   :  { %102 = vst.msk [vmem:[#allocation2] sm:$0x3] %vm101_vm2, %v98_v11 }
  0xe2   :  { %156 = shalt.err (!%p153_p4)
}
  0xe3   :  { %s157_s27 = scalar_lea.hbm %s226_s3, 32 }
  0xe4   :  { %p158_p5 = scmp.ne.s32.totalorder %s226_s3, %s157_s27  ;;  %p161_p6 = scmp.lt.u32.totalorder %s157_s27, %s226_s3 }
  0xe6   :  { %p163_p7 = pnand %p161_p6, %p158_p5 }
  0xe8   :  { %166 = shalt.err (!%p163_p7)
}
  0xe9   :  { %112 = dma.vmem_to_hbm [thread:$0]  %s110_s1, 32, %s226_s3, [#allocation3]  }
  0xea   :  { %167 = dma.done.wait [#allocation3], 32  }
  0xeb   :  { %168 = vsyncadd [#allocation3], 4294967264 }
  0xec   :  { %116 = vsyncpa [#allocation3], 1 }

</bundles_post_ra>
